<compile_context>
chip_gen: v7x
topology: tpu7x:2x2x1
jax: 0.10.0
libtpu: 0.0.40
codegen_flags: <defaults>
</compile_context>

<pallas_src>
import functools

import jax
import jax.numpy as jnp
from jax.experimental import pallas as pl
from jax.experimental.pallas import tpu as pltpu

EPS = 0.0           # GINConv eps (default, not trained)
BF16 = jnp.bfloat16
LANE = 128


# ---------------------------------------------------------------------------
# Fused Pallas kernel: GIN encoder (pos+neg, all k channels on lanes) + rho MLP
# ---------------------------------------------------------------------------
def fused_signnet_kernel(bias_off,                       # static {name: (offset, size)}
                         x_ref, adj_ref,
                         w10_ref, w20_ref, w11_ref, w21_ref, w12_ref, w22_ref,
                         rw1_ref, rw2_ref, bias_ref, out_ref):
    def bias(name):
        off, size = bias_off[name]                       # static, lane-aligned offsets
        return bias_ref[:, off:off + size]               # (1, size) f32

    adj = adj_ref[...]                                   # (N, N) bf16 (exact counts)
    h = x_ref[...]                                       # (N, k*cin) f32

    # ---- GIN layer 0 (positive branch only; negative follows by linearity:
    #      W1((1+eps)(-x) + A(-x)) + b1 = 2*b1 - pre_pos) -----------------------
    z = (1.0 + EPS) * h + jnp.dot(adj, h.astype(BF16),
                                  preferred_element_type=jnp.float32)
    b10 = bias('b10')
    pre = jnp.dot(z.astype(BF16), w10_ref[...],
                  preferred_element_type=jnp.float32) + b10
    h = jnp.concatenate([jnp.maximum(pre, 0.0),
                         jnp.maximum(2.0 * b10 - pre, 0.0)], axis=-1)  # (N, 2k*hid)
    h = jnp.dot(h.astype(BF16), w20_ref[...],
                preferred_element_type=jnp.float32) + bias('b20')

    # ---- GIN layer 1 ---------------------------------------------------------
    z = (1.0 + EPS) * h + jnp.dot(adj, h.astype(BF16),
                                  preferred_element_type=jnp.float32)
    z = jnp.maximum(jnp.dot(z.astype(BF16), w11_ref[...],
                            preferred_element_type=jnp.float32) + bias('b11'), 0.0)
    h = jnp.dot(z.astype(BF16), w21_ref[...],
                preferred_element_type=jnp.float32) + bias('b21')

    # ---- GIN layer 2 (second linear fused with the enc(x)+enc(-x) sum) --------
    z = (1.0 + EPS) * h + jnp.dot(adj, h.astype(BF16),
                                  preferred_element_type=jnp.float32)
    z = jnp.maximum(jnp.dot(z.astype(BF16), w12_ref[...],
                            preferred_element_type=jnp.float32) + bias('b12'), 0.0)
    henc = jnp.dot(z.astype(BF16), w22_ref[...],
                   preferred_element_type=jnp.float32) + bias('b22')
    # henc: (N, k*out_c) == (enc(x)+enc(-x)).transpose(0,1).reshape(N, -1)

    # ---- rho MLP (output padded to 128 lanes -> unmasked stores) --------------
    r = jnp.maximum(jnp.dot(henc.astype(BF16), rw1_ref[...],
                            preferred_element_type=jnp.float32) + bias('rb1'), 0.0)
    out = jnp.dot(r.astype(BF16), rw2_ref[...],
                  preferred_element_type=jnp.float32) + bias('rb2')
    out_ref[...] = out.astype(out_ref.dtype)


# ---------------------------------------------------------------------------
# One-time per-parameter-set preparation (hoisted out of the forward path)
# ---------------------------------------------------------------------------
def prepare_folded_params(enc_w, rho_w, k):
    (w1_0, b1_0, w2_0, b2_0,
     w1_1, b1_1, w2_1, b2_1,
     w1_2, b1_2, w2_2, b2_2) = enc_w
    rw1, rb1, rw2, rb2 = rho_w
    dim_pe = int(rw2.shape[1])
    out_lanes = max(LANE, ((dim_pe + LANE - 1) // LANE) * LANE)

    eye_k = jnp.eye(k, dtype=jnp.float32)
    eye_2k = jnp.eye(2 * k, dtype=jnp.float32)
    fold = jnp.concatenate([eye_k, eye_k], axis=0)       # (2k, k): pos+neg sum

    # Zero-pad final rho weight/bias to a lane-dense 128-wide output slab.
    rw2_pad = jnp.zeros((rw2.shape[0], out_lanes), jnp.float32).at[:, :dim_pe].set(rw2)
    rb2_pad = jnp.zeros((1, out_lanes), jnp.float32).at[:, :dim_pe].set(rb2)

    # Block-diagonal (channel-folded) weights, cast once to bf16 (MXU operands).
    weights = tuple(w.astype(BF16) for w in (
        jnp.kron(eye_k, w1_0),       # layer0 lin1 (pos only)
        jnp.kron(eye_2k, w2_0),      # layer0 lin2
        jnp.kron(eye_2k, w1_1),      # layer1 lin1
        jnp.kron(eye_2k, w2_1),      # layer1 lin2
        jnp.kron(eye_2k, w1_2),      # layer2 lin1
        jnp.kron(fold, w2_2),        # layer2 lin2 + sign-sum fold
        rw1,
        rw2_pad,
    ))

    # Pack all biases into one f32 slab with 128-lane-aligned chunk starts.
    biases = (
        ('b10', jnp.tile(b1_0, (1, k))),
        ('b20', jnp.tile(b2_0, (1, 2 * k))),
        ('b11', jnp.tile(b1_1, (1, 2 * k))),
        ('b21', jnp.tile(b2_1, (1, 2 * k))),
        ('b12', jnp.tile(b1_2, (1, 2 * k))),
        ('b22', jnp.tile(2.0 * b2_2, (1, k))),           # folded with pos+neg sum
        ('rb1', rb1),
        ('rb2', rb2_pad),
    )
    bias_off, chunks, off = {}, [], 0
    for name, b in biases:
        size = int(b.shape[1])
        padded = ((size + LANE - 1) // LANE) * LANE
        bias_off[name] = (off, size)
        chunk = jnp.zeros((1, padded), jnp.float32).at[:, :size].set(b.astype(jnp.float32))
        chunks.append(chunk)
        off += padded
    bias_slab = jnp.concatenate(chunks, axis=1)          # (1, total) f32

    return dict(weights=weights, bias_slab=bias_slab, bias_off=bias_off,
                dim_pe=dim_pe, out_lanes=out_lanes)


def build_dense_adjacency(edge_index, num_nodes, dtype=BF16):
    """Dense adjacency: agg_i = sum over edges (src -> dst=i) of h_src.
    Cacheable per graph.  bf16 counts are exact up to 256 duplicate edges."""
    # TODO(synk): sparse CSR aggregation with manual DMA for large N.
    adj = jnp.zeros((num_nodes, num_nodes), jnp.float32)
    adj = adj.at[edge_index[1], edge_index[0]].add(1.0)
    return adj.astype(dtype)


# ---------------------------------------------------------------------------
# Forward wrapper (adjacency + folded params are precomputed/cached by caller)
# ---------------------------------------------------------------------------
def gin_deepsigns_forward(x, adj, folded, batch_index=None):
    """x: (N, k, in_channels) float32; adj: (N, N) bf16 dense adjacency."""
    del batch_index  # unused in the reference forward pass
    N, k, cin = x.shape
    x_flat = x.reshape(N, k * cin).astype(jnp.float32)   # k channel groups on lanes

    weights = folded['weights']
    bias_slab = folded['bias_slab']
    bias_off = folded['bias_off']
    dim_pe = folded['dim_pe']
    out_lanes = folded['out_lanes']

    operands = (x_flat, adj, *weights, bias_slab)

    # Explicit VMEM limit sized from the actual resident set (+ headroom for
    # double-buffering and in-kernel activations), capped below v7x's 64 MiB.
    resident = sum(int(a.size) * a.dtype.itemsize for a in operands)
    resident += N * out_lanes * 4
    vmem_limit = int(min(max(4 * resident + (4 << 20), 16 << 20), 64 << 20))

    # Advisory cost estimate so XLA schedules neighbouring ops around the call.
    mm_flops = sum(2 * N * int(w.shape[0]) * int(w.shape[1]) for w in weights)
    agg_cols = int(weights[0].shape[0]) + int(weights[2].shape[0]) + int(weights[4].shape[0])
    cost = pl.CostEstimate(flops=int(mm_flops + 2 * N * N * agg_cols),
                           transcendentals=0,
                           bytes_accessed=int(resident))

    kernel = functools.partial(fused_signnet_kernel, bias_off)

    # Everything fits comfortably in VMEM at these sizes; a single grid-less call
    # with whole-array blocks is the simplest and fastest structure here.
    # TODO(synk): node-row "parallel" grid axis (adj BlockSpec (tm, N)) for large N
    # and for v7x's two TensorCores; row-batch multiple graphs to fill the MXU.
    out = pl.pallas_call(
        kernel,
        out_shape=jax.ShapeDtypeStruct((N, out_lanes), jnp.float32),
        cost_estimate=cost,
        compiler_params=pltpu.CompilerParams(vmem_limit_bytes=vmem_limit),
    )(*operands)
    return out[:, :dim_pe]


# ---------------------------------------------------------------------------
# Pure-JAX reference (same math, f32, no Pallas) for verification
# ---------------------------------------------------------------------------
def ref_forward(x, adj, enc_w, rho_w):
    xt = jnp.transpose(x, (1, 0, 2))

    def gin(h):
        for l in range(3):
            w1, b1, w2, b2 = enc_w[4 * l: 4 * l + 4]
            agg = jnp.einsum('ij,kjc->kic', adj, h)
            z = (1.0 + EPS) * h + agg
            z = jnp.maximum(jnp.einsum('knc,cd->knd', z, w1) + b1, 0.0)
            h = jnp.einsum('knc,cd->knd', z, w2) + b2
        return h

    enc = gin(xt) + gin(-xt)
    h = jnp.transpose(enc, (1, 0, 2)).reshape(x.shape[0], -1)
    rw1, rb1, rw2, rb2 = rho_w
    return jnp.maximum(h @ rw1 + rb1, 0.0) @ rw2 + rb2


# ---------------------------------------------------------------------------
# Deterministic parameter init (Linear-style uniform(-1/sqrt(fan_in), 1/sqrt(fan_in)))
# ---------------------------------------------------------------------------
def init_linear(key, fan_in, fan_out):
    kw, kb = jax.random.split(key)
    bound = 1.0 / jnp.sqrt(fan_in)
    w = jax.random.uniform(kw, (fan_in, fan_out), jnp.float32, -bound, bound)
    b = jax.random.uniform(kb, (1, fan_out), jnp.float32, -bound, bound)
    return w, b


if __name__ == "__main__":
    # Small, module-consistent shapes
    N, k = 32, 4            # nodes, graph signals (eigenvectors)
    in_channels = 4
    hidden = 32
    out_channels = 8
    dim_pe = 16
    E = 64                  # number of edges

    key = jax.random.PRNGKey(0)
    keys = jax.random.split(key, 16)

    # Node features (N, k, in_channels)
    x = jax.random.normal(keys[0], (N, k, in_channels), jnp.float32)
    # Edge index (2, E): src, dst
    src = jax.random.randint(keys[1], (E,), 0, N, jnp.int32)
    dst = jax.random.randint(keys[2], (E,), 0, N, jnp.int32)
    edge_index = jnp.stack([src, dst], axis=0)
    batch_index = jnp.zeros((N,), jnp.int32)

    # GIN encoder weights: 3 GINConv layers, each a 2-layer MLP
    layer_dims = [(in_channels, hidden, hidden),
                  (hidden, hidden, hidden),
                  (hidden, hidden, out_channels)]
    enc_w = []
    kidx = 3
    for (ci, ch, co) in layer_dims:
        w1, b1 = init_linear(keys[kidx], ci, ch); kidx += 1
        w2, b2 = init_linear(keys[kidx], ch, co); kidx += 1
        enc_w += [w1, b1, w2, b2]

    # rho MLP: (k*out_channels) -> hidden -> dim_pe
    rw1, rb1 = init_linear(keys[kidx], out_channels * k, hidden); kidx += 1
    rw2, rb2 = init_linear(keys[kidx], hidden, dim_pe); kidx += 1
    rho_w = (rw1, rb1, rw2, rb2)

    # One-time preparation (cached across calls in real use)
    folded = prepare_folded_params(enc_w, rho_w, k)
    adj_bf16 = build_dense_adjacency(edge_index, N, BF16)

    # Run the fused Pallas kernel
    out = gin_deepsigns_forward(x, adj_bf16, folded, batch_index)
    out = jax.block_until_ready(out)

    # Verify against the pure-JAX f32 reference (tolerance loosened for bf16 MXU ops)
    adj_f32 = build_dense_adjacency(edge_index, N, jnp.float32)
    ref = jax.block_until_ready(ref_forward(x, adj_f32, enc_w, rho_w))
    assert out.shape == (N, dim_pe)
    assert jnp.allclose(out, ref, atol=1e-1, rtol=1e-1), "mismatch vs reference"

    print("KERNEL_OK")
</pallas_src>

<mosaic_0001>
module attributes {stable_mosaic.version = 11 : i64} {
  func.func @fused_signnet_kernel(%arg0: memref<32x16xf32, #tpu.memory_space<vmem>>, %arg1: memref<32x32xbf16, #tpu.memory_space<vmem>>, %arg2: memref<16x128xbf16, #tpu.memory_space<vmem>>, %arg3: memref<256x256xbf16, #tpu.memory_space<vmem>>, %arg4: memref<256x256xbf16, #tpu.memory_space<vmem>>, %arg5: memref<256x256xbf16, #tpu.memory_space<vmem>>, %arg6: memref<256x256xbf16, #tpu.memory_space<vmem>>, %arg7: memref<256x32xbf16, #tpu.memory_space<vmem>>, %arg8: memref<32x32xbf16, #tpu.memory_space<vmem>>, %arg9: memref<32x128xbf16, #tpu.memory_space<vmem>>, %arg10: memref<1x1536xf32, #tpu.memory_space<vmem>>, %arg11: memref<32x128xf32, #tpu.memory_space<vmem>>) attributes {dimension_semantics = [], scalar_prefetch = 0 : i64, scratch_operands = 0 : i64, tpu.core_type = #tpu.core_type<tc>} {
    %c0 = arith.constant 0 : index
    %c0_0 = arith.constant 0 : index
    %0 = vector.load %arg1[%c0, %c0_0] : memref<32x32xbf16, #tpu.memory_space<vmem>>, vector<32x32xbf16>
    %c0_1 = arith.constant 0 : index
    %c0_2 = arith.constant 0 : index
    %1 = vector.load %arg0[%c0_1, %c0_2] : memref<32x16xf32, #tpu.memory_space<vmem>>, vector<32x16xf32>
    %cst = arith.constant 1.000000e+00 : f32
    %2 = vector.broadcast %cst : f32 to vector<32x16xf32>
    %3 = arith.mulf %2, %1 : vector<32x16xf32>
    %4 = arith.truncf %1 : vector<32x16xf32> to vector<32x16xbf16>
    %cst_3 = arith.constant dense<0.000000e+00> : vector<32x16xf32>
    %5 = tpu.matmul %0, %4, %cst_3 {dimension_numbers = #tpu.dot_dimension_numbers<[1], [0], [0], [1], [0, 0, 1, 1], [], []>} : vector<32x32xbf16>, vector<32x16xbf16>, vector<32x16xf32> -> vector<32x16xf32>
    %6 = arith.addf %3, %5 : vector<32x16xf32>
    %c0_4 = arith.constant 0 : index
    %c0_5 = arith.constant 0 : index
    %7 = vector.load %arg10[%c0_4, %c0_5] : memref<1x1536xf32, #tpu.memory_space<vmem>>, vector<1x128xf32>
    %8 = arith.truncf %6 : vector<32x16xf32> to vector<32x16xbf16>
    %c0_6 = arith.constant 0 : index
    %c0_7 = arith.constant 0 : index
    %9 = vector.load %arg2[%c0_6, %c0_7] : memref<16x128xbf16, #tpu.memory_space<vmem>>, vector<16x128xbf16>
    %cst_8 = arith.constant dense<0.000000e+00> : vector<32x128xf32>
    %10 = tpu.matmul %8, %9, %cst_8 {dimension_numbers = #tpu.dot_dimension_numbers<[1], [0], [0], [1], [0, 0, 1, 1], [], []>} : vector<32x16xbf16>, vector<16x128xbf16>, vector<32x128xf32> -> vector<32x128xf32>
    %11 = vector.broadcast %7 : vector<1x128xf32> to vector<32x128xf32>
    %12 = arith.addf %10, %11 : vector<32x128xf32>
    %cst_9 = arith.constant 0.000000e+00 : f32
    %13 = vector.broadcast %cst_9 : f32 to vector<32x128xf32>
    %14 = arith.maximumf %12, %13 : vector<32x128xf32>
    %cst_10 = arith.constant 2.000000e+00 : f32
    %15 = vector.broadcast %cst_10 : f32 to vector<1x128xf32>
    %16 = arith.mulf %15, %7 : vector<1x128xf32>
    %17 = vector.broadcast %16 : vector<1x128xf32> to vector<32x128xf32>
    %18 = arith.subf %17, %12 : vector<32x128xf32>
    %cst_11 = arith.constant 0.000000e+00 : f32
    %19 = vector.broadcast %cst_11 : f32 to vector<32x128xf32>
    %20 = arith.maximumf %18, %19 : vector<32x128xf32>
    %21 = tpu.concatenate %14, %20 in 1 : vector<32x128xf32>, vector<32x128xf32> -> vector<32x256xf32>
    %22 = arith.truncf %21 : vector<32x256xf32> to vector<32x256xbf16>
    %c0_12 = arith.constant 0 : index
    %c0_13 = arith.constant 0 : index
    %23 = vector.load %arg3[%c0_12, %c0_13] : memref<256x256xbf16, #tpu.memory_space<vmem>>, vector<256x256xbf16>
    %cst_14 = arith.constant dense<0.000000e+00> : vector<32x256xf32>
    %24 = tpu.matmul %22, %23, %cst_14 {dimension_numbers = #tpu.dot_dimension_numbers<[1], [0], [0], [1], [0, 0, 1, 1], [], []>} : vector<32x256xbf16>, vector<256x256xbf16>, vector<32x256xf32> -> vector<32x256xf32>
    %c0_15 = arith.constant 0 : index
    %c128 = arith.constant 128 : index
    %25 = vector.load %arg10[%c0_15, %c128] : memref<1x1536xf32, #tpu.memory_space<vmem>>, vector<1x256xf32>
    %26 = vector.broadcast %25 : vector<1x256xf32> to vector<32x256xf32>
    %27 = arith.addf %24, %26 : vector<32x256xf32>
    %cst_16 = arith.constant 1.000000e+00 : f32
    %28 = vector.broadcast %cst_16 : f32 to vector<32x256xf32>
    %29 = arith.mulf %28, %27 : vector<32x256xf32>
    %30 = arith.truncf %27 : vector<32x256xf32> to vector<32x256xbf16>
    %cst_17 = arith.constant dense<0.000000e+00> : vector<32x256xf32>
    %31 = tpu.matmul %0, %30, %cst_17 {dimension_numbers = #tpu.dot_dimension_numbers<[1], [0], [0], [1], [0, 0, 1, 1], [], []>} : vector<32x32xbf16>, vector<32x256xbf16>, vector<32x256xf32> -> vector<32x256xf32>
    %32 = arith.addf %29, %31 : vector<32x256xf32>
    %33 = arith.truncf %32 : vector<32x256xf32> to vector<32x256xbf16>
    %c0_18 = arith.constant 0 : index
    %c0_19 = arith.constant 0 : index
    %34 = vector.load %arg4[%c0_18, %c0_19] : memref<256x256xbf16, #tpu.memory_space<vmem>>, vector<256x256xbf16>
    %cst_20 = arith.constant dense<0.000000e+00> : vector<32x256xf32>
    %35 = tpu.matmul %33, %34, %cst_20 {dimension_numbers = #tpu.dot_dimension_numbers<[1], [0], [0], [1], [0, 0, 1, 1], [], []>} : vector<32x256xbf16>, vector<256x256xbf16>, vector<32x256xf32> -> vector<32x256xf32>
    %c0_21 = arith.constant 0 : index
    %c384 = arith.constant 384 : index
    %36 = vector.load %arg10[%c0_21, %c384] : memref<1x1536xf32, #tpu.memory_space<vmem>>, vector<1x256xf32>
    %37 = vector.broadcast %36 : vector<1x256xf32> to vector<32x256xf32>
    %38 = arith.addf %35, %37 : vector<32x256xf32>
    %cst_22 = arith.constant 0.000000e+00 : f32
    %39 = vector.broadcast %cst_22 : f32 to vector<32x256xf32>
    %40 = arith.maximumf %38, %39 : vector<32x256xf32>
    %41 = arith.truncf %40 : vector<32x256xf32> to vector<32x256xbf16>
    %c0_23 = arith.constant 0 : index
    %c0_24 = arith.constant 0 : index
    %42 = vector.load %arg5[%c0_23, %c0_24] : memref<256x256xbf16, #tpu.memory_space<vmem>>, vector<256x256xbf16>
    %cst_25 = arith.constant dense<0.000000e+00> : vector<32x256xf32>
    %43 = tpu.matmul %41, %42, %cst_25 {dimension_numbers = #tpu.dot_dimension_numbers<[1], [0], [0], [1], [0, 0, 1, 1], [], []>} : vector<32x256xbf16>, vector<256x256xbf16>, vector<32x256xf32> -> vector<32x256xf32>
    %c0_26 = arith.constant 0 : index
    %c640 = arith.constant 640 : index
    %44 = vector.load %arg10[%c0_26, %c640] : memref<1x1536xf32, #tpu.memory_space<vmem>>, vector<1x256xf32>
    %45 = vector.broadcast %44 : vector<1x256xf32> to vector<32x256xf32>
    %46 = arith.addf %43, %45 : vector<32x256xf32>
    %cst_27 = arith.constant 1.000000e+00 : f32
    %47 = vector.broadcast %cst_27 : f32 to vector<32x256xf32>
    %48 = arith.mulf %47, %46 : vector<32x256xf32>
    %49 = arith.truncf %46 : vector<32x256xf32> to vector<32x256xbf16>
    %cst_28 = arith.constant dense<0.000000e+00> : vector<32x256xf32>
    %50 = tpu.matmul %0, %49, %cst_28 {dimension_numbers = #tpu.dot_dimension_numbers<[1], [0], [0], [1], [0, 0, 1, 1], [], []>} : vector<32x32xbf16>, vector<32x256xbf16>, vector<32x256xf32> -> vector<32x256xf32>
    %51 = arith.addf %48, %50 : vector<32x256xf32>
    %52 = arith.truncf %51 : vector<32x256xf32> to vector<32x256xbf16>
    %c0_29 = arith.constant 0 : index
    %c0_30 = arith.constant 0 : index
    %53 = vector.load %arg6[%c0_29, %c0_30] : memref<256x256xbf16, #tpu.memory_space<vmem>>, vector<256x256xbf16>
    %cst_31 = arith.constant dense<0.000000e+00> : vector<32x256xf32>
    %54 = tpu.matmul %52, %53, %cst_31 {dimension_numbers = #tpu.dot_dimension_numbers<[1], [0], [0], [1], [0, 0, 1, 1], [], []>} : vector<32x256xbf16>, vector<256x256xbf16>, vector<32x256xf32> -> vector<32x256xf32>
    %c0_32 = arith.constant 0 : index
    %c896 = arith.constant 896 : index
    %55 = vector.load %arg10[%c0_32, %c896] : memref<1x1536xf32, #tpu.memory_space<vmem>>, vector<1x256xf32>
    %56 = vector.broadcast %55 : vector<1x256xf32> to vector<32x256xf32>
    %57 = arith.addf %54, %56 : vector<32x256xf32>
    %cst_33 = arith.constant 0.000000e+00 : f32
    %58 = vector.broadcast %cst_33 : f32 to vector<32x256xf32>
    %59 = arith.maximumf %57, %58 : vector<32x256xf32>
    %60 = arith.truncf %59 : vector<32x256xf32> to vector<32x256xbf16>
    %c0_34 = arith.constant 0 : index
    %c0_35 = arith.constant 0 : index
    %61 = vector.load %arg7[%c0_34, %c0_35] : memref<256x32xbf16, #tpu.memory_space<vmem>>, vector<256x32xbf16>
    %cst_36 = arith.constant dense<0.000000e+00> : vector<32x32xf32>
    %62 = tpu.matmul %60, %61, %cst_36 {dimension_numbers = #tpu.dot_dimension_numbers<[1], [0], [0], [1], [0, 0, 1, 1], [], []>} : vector<32x256xbf16>, vector<256x32xbf16>, vector<32x32xf32> -> vector<32x32xf32>
    %c0_37 = arith.constant 0 : index
    %c1152 = arith.constant 1152 : index
    %63 = vector.load %arg10[%c0_37, %c1152] : memref<1x1536xf32, #tpu.memory_space<vmem>>, vector<1x32xf32>
    %64 = vector.broadcast %63 : vector<1x32xf32> to vector<32x32xf32>
    %65 = arith.addf %62, %64 : vector<32x32xf32>
    %66 = arith.truncf %65 : vector<32x32xf32> to vector<32x32xbf16>
    %c0_38 = arith.constant 0 : index
    %c0_39 = arith.constant 0 : index
    %67 = vector.load %arg8[%c0_38, %c0_39] : memref<32x32xbf16, #tpu.memory_space<vmem>>, vector<32x32xbf16>
    %cst_40 = arith.constant dense<0.000000e+00> : vector<32x32xf32>
    %68 = tpu.matmul %66, %67, %cst_40 {dimension_numbers = #tpu.dot_dimension_numbers<[1], [0], [0], [1], [0, 0, 1, 1], [], []>} : vector<32x32xbf16>, vector<32x32xbf16>, vector<32x32xf32> -> vector<32x32xf32>
    %c0_41 = arith.constant 0 : index
    %c1280 = arith.constant 1280 : index
    %69 = vector.load %arg10[%c0_41, %c1280] : memref<1x1536xf32, #tpu.memory_space<vmem>>, vector<1x32xf32>
    %70 = vector.broadcast %69 : vector<1x32xf32> to vector<32x32xf32>
    %71 = arith.addf %68, %70 : vector<32x32xf32>
    %cst_42 = arith.constant 0.000000e+00 : f32
    %72 = vector.broadcast %cst_42 : f32 to vector<32x32xf32>
    %73 = arith.maximumf %71, %72 : vector<32x32xf32>
    %74 = arith.truncf %73 : vector<32x32xf32> to vector<32x32xbf16>
    %c0_43 = arith.constant 0 : index
    %c0_44 = arith.constant 0 : index
    %75 = vector.load %arg9[%c0_43, %c0_44] : memref<32x128xbf16, #tpu.memory_space<vmem>>, vector<32x128xbf16>
    %cst_45 = arith.constant dense<0.000000e+00> : vector<32x128xf32>
    %76 = tpu.matmul %74, %75, %cst_45 {dimension_numbers = #tpu.dot_dimension_numbers<[1], [0], [0], [1], [0, 0, 1, 1], [], []>} : vector<32x32xbf16>, vector<32x128xbf16>, vector<32x128xf32> -> vector<32x128xf32>
    %c0_46 = arith.constant 0 : index
    %c1408 = arith.constant 1408 : index
    %77 = vector.load %arg10[%c0_46, %c1408] : memref<1x1536xf32, #tpu.memory_space<vmem>>, vector<1x128xf32>
    %78 = vector.broadcast %77 : vector<1x128xf32> to vector<32x128xf32>
    %79 = arith.addf %76, %78 : vector<32x128xf32>
    %c0_47 = arith.constant 0 : index
    %c0_48 = arith.constant 0 : index
    %80 = vector.load %arg11[%c0_47, %c0_48] : memref<32x128xf32, #tpu.memory_space<vmem>>, vector<32x128xf32>
    tpu.vector_store %arg11[%c0_47, %c0_48], %79 {strides = array<i32>} : memref<32x128xf32, #tpu.memory_space<vmem>>, vector<32x128xf32>,
    return
  }
}

</mosaic_0001>

<bundles_post_ra>
// kernel: tpu_custom_call.1
= control target key start
LH: loop header
LB: loop body
LE: loop exit
PB: predicated region body
PF: predicated region fallthrough
CT: control target
= control target key end

     0   :  { %16 = vsyncpa [#allocation3], 0  ;;  %s2782_s0 = inlined_call_operand.vmem [shape: f32[32,16], index: 0, kind: input, shape index: {}]   ;;  %s2783_s1 = inlined_call_operand.vmem [shape: bf16[32,32], index: 1, kind: input, shape index: {}]   ;;  %s2784_s2 = inlined_call_operand.vmem [shape: bf16[16,128], index: 2, kind: input, shape index: {}]   ;;  %s2785_s3 = inlined_call_operand.hbm [shape: bf16[256,256], index: 3, kind: input, shape index: {}]   ;;  %s2786_s4 = inlined_call_operand.hbm [shape: bf16[256,256], index: 4, kind: input, shape index: {}]   ;;  %s2787_s5 = inlined_call_operand.hbm [shape: bf16[256,256], index: 5, kind: input, shape index: {}]   ;;  %s2788_s6 = inlined_call_operand.hbm [shape: bf16[256,256], index: 6, kind: input, shape index: {}]   ;;  %s2789_s7 = inlined_call_operand.vmem [shape: bf16[256,32], index: 7, kind: input, shape index: {}]   ;;  %s2790_s8 = inlined_call_operand.vmem [shape: bf16[32,32], index: 8, kind: input, shape index: {}]   ;;  %s2791_s9 = inlined_call_operand.vmem [shape: bf16[32,128], index: 9, kind: input, shape index: {}]   ;;  %s2792_s10 = inlined_call_operand.vmem [shape: f32[1,1536], index: 10, kind: input, shape index: {}]   ;;  %s2793_s11 = inlined_call_operand.hbm [shape: f32[32,128], index: 11, kind: output, shape index: {}]  }
   0x1   :  { %17 = vsyncpa [#allocation6], 0 }
   0x2   :  { %18 = vsyncpa [#allocation9], 0 }
   0x3   :  { %19 = vsyncpa [#allocation4], 0  ;;  %s2414_s17 = smov [#allocation5]   ;;  %s2415_s19 = smov [#allocation2]  }
   0x4   :  { %s43_s18 = sshll.u32 %s2414_s17, 4  ;;  %s31_s20 = sshll.u32 %s2415_s19, 4  ;;  %s44_s18 = int_to_ptr.vmem [resolvable:$true] %s43_s18  ;;  %s2482_s20 = int_to_ptr.vmem [resolvable:$true] %s31_s20 }
   0x5   :  { %s2296_s23 = scalar_lea.hbm %s2786_s4, 4096 }
   0x6   :  { %p2297_p0 = scmp.ne.s32.totalorder %s2786_s4, %s2296_s23  ;;  %p2300_p1 = scmp.lt.u32.totalorder %s2296_s23, %s2786_s4 }
   0x8   :  { %p2302_p2 = pnand %p2300_p1, %p2297_p0 }
   0xa   :  { %2305 = shalt.err (!%p2302_p2)
}
   0xb   :  { %s2306_s28 = scalar_lea.vmem %s44_s18, 4096  ;;  %p2311_p4 = scmp.lt.s32.totalorder %s44_s18, %s44_s18 }
   0xc   :  { %p2307_p3 = scmp.ne.s32.totalorder %s44_s18, %s2306_s28  ;;  %p2312_p5 = scmp.lt.s32.totalorder %s2306_s28, %s2306_s28 }
   0xe   :  { %p2313_p6 = por %p2312_p5, %p2311_p4 }
  0x10   :  { %p2314_p7 = pnand %p2313_p6, %p2307_p3 }
  0x12   :  { %2317 = shalt.err (!%p2314_p7)
}
  0x13   :  { %s2416_s29 = smov 128   ;;  %s2417_s30 = smov 8  }
  0x14   :  { %49 = dma.hbm_to_vmem [thread:$0]  %s2786_s4, 4096, %s44_s18, [#allocation6], %s2416_s29, %s2416_s29, %s2417_s30  }
  0x15   :  { %s2318_s16 = scalar_lea.hbm %s2785_s3, 4096 }
  0x16   :  { %p2319_p8 = scmp.ne.s32.totalorder %s2785_s3, %s2318_s16  ;;  %p2322_p9 = scmp.lt.u32.totalorder %s2318_s16, %s2785_s3 }
  0x18   :  { %p2324_p10 = pnand %p2322_p9, %p2319_p8 }
  0x1a   :  { %2327 = shalt.err (!%p2324_p10)
}
  0x1b   :  { %s2328_s23 = scalar_lea.vmem %s2482_s20, 4096  ;;  %p2333_p12 = scmp.lt.s32.totalorder %s2482_s20, %s2482_s20 }
  0x1c   :  { %p2329_p11 = scmp.ne.s32.totalorder %s2482_s20, %s2328_s23  ;;  %p2334_p13 = scmp.lt.s32.totalorder %s2328_s23, %s2328_s23 }
  0x1e   :  { %p2335_p0 = por %p2334_p13, %p2333_p12 }
  0x20   :  { %p2336_p1 = pnand %p2335_p0, %p2329_p11 }
  0x22   :  { %2339 = shalt.err (!%p2336_p1)
}
  0x23   :  { %37 = dma.hbm_to_vmem [thread:$0]  %s2785_s3, 4096, %s2482_s20, [#allocation3], %s2416_s29, %s2416_s29, %s2417_s30  }
  0x24   :  { %s2418_s24 = smov [#allocation7]   ;;  %s2419_s26 = smov [#allocation8]  }
  0x25   :  { %s55_s25 = sshll.u32 %s2418_s24, 4  ;;  %s67_s27 = sshll.u32 %s2419_s26, 4  ;;  %s56_s25 = int_to_ptr.vmem [resolvable:$true] %s55_s25  ;;  %s2519_s27 = int_to_ptr.vmem [resolvable:$true] %s67_s27 }
  0x26   :  { %s2340_s13 = scalar_lea.hbm %s2787_s5, 4096 }
  0x27   :  { %p2341_p2 = scmp.ne.s32.totalorder %s2787_s5, %s2340_s13  ;;  %p2344_p3 = scmp.lt.u32.totalorder %s2340_s13, %s2787_s5 }
  0x29   :  { %p2346_p4 = pnand %p2344_p3, %p2341_p2 }
  0x2b   :  { %2349 = shalt.err (!%p2346_p4)
}
  0x2c   :  { %s2350_s3 = scalar_lea.vmem %s56_s25, 4096  ;;  %p2355_p6 = scmp.lt.s32.totalorder %s56_s25, %s56_s25 }
  0x2d   :  { %p2351_p5 = scmp.ne.s32.totalorder %s56_s25, %s2350_s3  ;;  %p2356_p7 = scmp.lt.s32.totalorder %s2350_s3, %s2350_s3 }
  0x2f   :  { %p2357_p8 = por %p2356_p7, %p2355_p6 }
  0x31   :  { %p2358_p9 = pnand %p2357_p8, %p2351_p5 }
  0x33   :  { %2361 = shalt.err (!%p2358_p9)
}
  0x34   :  { %61 = dma.hbm_to_vmem [thread:$0]  %s2787_s5, 4096, %s56_s25, [#allocation6], %s2416_s29, %s2416_s29, %s2417_s30  }
  0x35   :  { %s2362_s23 = scalar_lea.hbm %s2788_s6, 4096 }
  0x36   :  { %p2363_p10 = scmp.ne.s32.totalorder %s2788_s6, %s2362_s23  ;;  %p2366_p11 = scmp.lt.u32.totalorder %s2362_s23, %s2788_s6 }
  0x38   :  { %p2368_p12 = pnand %p2366_p11, %p2363_p10 }
  0x3a   :  { %2371 = shalt.err (!%p2368_p12)
}
  0x3b   :  { %s2372_s28 = scalar_lea.vmem %s2519_s27, 4096  ;;  %p2377_p0 = scmp.lt.s32.totalorder %s2519_s27, %s2519_s27 }
  0x3c   :  { %p2373_p13 = scmp.ne.s32.totalorder %s2519_s27, %s2372_s28  ;;  %p2378_p1 = scmp.lt.s32.totalorder %s2372_s28, %s2372_s28 }
  0x3e   :  { %p2379_p2 = por %p2378_p1, %p2377_p0 }
  0x40   :  { %p2380_p3 = pnand %p2379_p2, %p2373_p13 }
  0x42   :  { %2383 = shalt.err (!%p2380_p3)
}
  0x43   :  { %73 = dma.hbm_to_vmem [thread:$0]  %s2788_s6, 4096, %s2519_s27, [#allocation9], %s2416_s29, %s2416_s29, %s2417_s30  }
  0x44   :  { %2406 = dma.done.wait [#allocation3], 4096  }
  0x45   :  { %2407 = vsyncadd [#allocation3], 4294963200 }
  0x46   :  { %2408 = dma.done.wait [#allocation6], 8192  }
  0x47   :  { %2409 = vsyncadd [#allocation6], 4294959104 }
  0x48   :  { %2410 = dma.done.wait [#allocation9], 4096  }
  0x49   :  { %2411 = vsyncadd [#allocation9], 4294963200  ;;  %v99_v0 = vld [vmem:[%s2782_s0] sm:$0xff]  ;;  %v100_v1 = vld [vmem:[%s2782_s0 + $0x8] sm:$0xff]  ;;  %vm115_vm0 = vcmask 261120   ;;  %vm192_vm1 = vcmask 130048   ;;  %v181_v51 = vlaneseq }
  0x4a   :  { %v101_v2 = vld [vmem:[%s2782_s0 + $0x10] sm:$0xff]  ;;  %v103_v3 = vpack.c.bf16 %v100_v1, %v99_v0  ;;  %v102_v4 = vld [vmem:[%s2782_s0 + $0x18] sm:$0xff]  ;;  %v2571_v6 = vld [vmem:[%s2783_s1] sm:$0xff]   ;;  %s2421_s12 = smov [#allocation10]  }
  0x4b   :  { %v104_v5 = vpack.c.bf16 %v102_v4, %v101_v2  ;;  %2045 = vmatprep.mubr.msk.bf16.mxu0 %vm115_vm0, %v2571_v6  ;;  %v2578_v7 = vld [vmem:[%s2783_s1 + $0x8] sm:$0xff]   ;;  %v2081_v8 = vld [vmem:[%s2784_s2] sm:$0xff]   ;;  %v2087_v21 = vld [vmem:[#allocation2 + $0x14] ss:$8 sps:$4 sm:$0xff]   ;;  %v182_v52 = vshrl.u32 %v181_v51, 7  ;;  %s1818_s13 = sshll.u32 %s2421_s12, 4  ;;  %s1819_s13 = int_to_ptr.vmem [resolvable:$true] %s1818_s13 }
  0x4c   :  { %2041 = vmatprep.subr.bf16.mxu0 %v103_v3  ;;  %2049 = vmatprep.subr.bf16.mxu1 %v2081_v8  ;;  %v2084_v9 = vld [vmem:[#allocation2 + $0x4] ss:$8 sps:$4 sm:$0xff]   ;;  %v2082_v20 = vld [vmem:[#allocation2] ss:$8 sps:$4 sm:$0xff]   ;;  %v2085_v22 = vld [vmem:[#allocation2 + $0x10] ss:$8 sps:$4 sm:$0xff]   ;;  %p2389_p5 = scmp.lt.s32.totalorder %s1819_s13, %s1819_s13 }
  0x4d   :  { %2042 = vmatpush3.bf16.msra.mxu0 %v103_v3  ;;  %2050 = vmatpush3.bf16.msra.mxu1 %v2081_v8  ;;  %v2090_v23 = vld [vmem:[#allocation2 + $0x24] ss:$8 sps:$4 sm:$0xff]   ;;  %v2088_v24 = vld [vmem:[#allocation2 + $0x20] ss:$8 sps:$4 sm:$0xff]   ;;  %v2093_v25 = vld [vmem:[#allocation2 + $0x34] ss:$8 sps:$4 sm:$0xff]  }
  0x4e   :  { %2043 = vmatprep.subr.bf16.mxu0 %v104_v5  ;;  %475 = vmatprep.subr.bf16.mxu1 %v2084_v9  ;;  %v2091_v26 = vld [vmem:[#allocation2 + $0x30] ss:$8 sps:$4 sm:$0xff]   ;;  %v2096_v27 = vld [vmem:[#allocation2 + $0x44] ss:$8 sps:$4 sm:$0xff]   ;;  %v2094_v28 = vld [vmem:[#allocation2 + $0x40] ss:$8 sps:$4 sm:$0xff]  }
  0x4f   :  { %v2099_v29 = vld [vmem:[#allocation2 + $0x54] ss:$8 sps:$4 sm:$0xff]   ;;  %v2097_v30 = vld [vmem:[#allocation2 + $0x50] ss:$8 sps:$4 sm:$0xff]   ;;  %v2102_v31 = vld [vmem:[#allocation2 + $0x64] ss:$8 sps:$4 sm:$0xff]  }
  0x50   :  { %v2100_v32 = vld [vmem:[#allocation2 + $0x60] ss:$8 sps:$4 sm:$0xff]   ;;  %v2105_v33 = vld [vmem:[#allocation2 + $0x74] ss:$8 sps:$4 sm:$0xff]   ;;  %v2103_v34 = vld [vmem:[#allocation2 + $0x70] ss:$8 sps:$4 sm:$0xff]  }
  0x51   :  { %2044 = vmatpush3.bf16.msra.mxu0 %v104_v5  ;;  %v2108_v35 = vld [vmem:[#allocation2 + $0x84] ss:$8 sps:$4 sm:$0xff]   ;;  %v2106_v36 = vld [vmem:[#allocation2 + $0x80] ss:$8 sps:$4 sm:$0xff]   ;;  %v2111_v37 = vld [vmem:[#allocation2 + $0x94] ss:$8 sps:$4 sm:$0xff]  }
  0x52   :  { %v2109_v38 = vld [vmem:[#allocation2 + $0x90] ss:$8 sps:$4 sm:$0xff]   ;;  %v2114_v39 = vld [vmem:[#allocation2 + $0xa4] ss:$8 sps:$4 sm:$0xff]   ;;  %v2112_v40 = vld [vmem:[#allocation2 + $0xa0] ss:$8 sps:$4 sm:$0xff]  }
  0x53   :  { %v2117_v41 = vld [vmem:[#allocation2 + $0xb4] ss:$8 sps:$4 sm:$0xff]   ;;  %v2115_v42 = vld [vmem:[#allocation2 + $0xb0] ss:$8 sps:$4 sm:$0xff]   ;;  %v2120_v43 = vld [vmem:[#allocation2 + $0xc4] ss:$8 sps:$4 sm:$0xff]  }
  0x54   :  { %2046 = vmatmul.mubr.msk.bf16.vlgmr.msra.gmra.mrb[0].mxu0 %vm115_vm0, %v2578_v7  ;;  %v2118_v44 = vld [vmem:[#allocation2 + $0xc0] ss:$8 sps:$4 sm:$0xff]   ;;  %v2123_v45 = vld [vmem:[#allocation2 + $0xd4] ss:$8 sps:$4 sm:$0xff]   ;;  %v2121_v46 = vld [vmem:[#allocation2 + $0xd0] ss:$8 sps:$4 sm:$0xff]  }
  0x55   :  { %v2126_v47 = vld [vmem:[#allocation2 + $0xe4] ss:$8 sps:$4 sm:$0xff]   ;;  %v2124_v48 = vld [vmem:[#allocation2 + $0xe0] ss:$8 sps:$4 sm:$0xff]   ;;  %v2129_v49 = vld [vmem:[#allocation2 + $0xf4] ss:$8 sps:$4 sm:$0xff]  }
  0x56   :  { %v2127_v50 = vld [vmem:[#allocation2 + $0xf0] ss:$8 sps:$4 sm:$0xff]   ;;  %v175_v53 = vld [vmem:[%s2792_s10] sm:$0x1]  ;;  %v2588_v54 = vsub.s32 0, %v182_v52  ;;  %s2384_s14 = scalar_lea.vmem %s1819_s13, 512 }
  0x57   :  { %v252_v55 = vmul.f32 2.0, %v175_v53  ;;  %v2141_v51 = vld [vmem:[#allocation5 + $0x34] ss:$8 sps:$4 sm:$0xff]   ;;  %p2385_p4 = scmp.ne.s32.totalorder %s1819_s13, %s2384_s14  ;;  %p2390_p6 = scmp.lt.s32.totalorder %s2384_s14, %s2384_s14 }
  0x58   :  { %v184_v56 = vrot.slane %v175_v53, %v2588_v54  ;;  %v2144_v53 = vld [vmem:[#allocation5 + $0x44] ss:$8 sps:$4 sm:$0xff]  }
  0x59   :  { %v257_v57 = vrot.slane %v252_v55, %v2588_v54  ;;  %v2142_v55 = vld [vmem:[#allocation5 + $0x40] ss:$8 sps:$4 sm:$0xff]   ;;  %p2391_p7 = por %p2390_p6, %p2389_p5 }
  0x5b   :  { %p2392_p8 = pnand %p2391_p7, %p2385_p4 }
 0x127   :  { %v2047_v10 = vpop.f32.mrb[0].mxu0 }
 0x128   :  { %v156_v11 = vpop.f32.mrb[1].mxu0  ;;  %v173_v13 = vadd.f32 %v2047_v10, %v101_v2 }
 0x129   :  { %v2048_v12 = vpop.f32.mrb[2].mxu0  ;;  %v171_v16 = vadd.f32 %v156_v11, %v99_v0 }
 0x12a   :  { %v174_v14 = vadd.f32 %v2048_v12, %v102_v4  ;;  %v159_v15 = vpop.f32.mrb[3].mxu0 }
 0x12b   :  { %v172_v17 = vadd.f32 %v159_v15, %v100_v1 }
 0x12c   :  { %v177_v18 = vpack.c.bf16 %v174_v14, %v173_v13 }
 0x12d   :  { %v176_v19 = vpack.c.bf16 %v172_v17, %v171_v16 }
 0x12f   :  { %2051 = vmatprep.mubr.msk.bf16.mxu1 %vm192_vm1, %v176_v19 }
 0x130   :  { %2052 = vmatmul.mubr.msk.bf16.vlgmr.msra.gmra.mrb[0].mxu1 %vm192_vm1, %v177_v18 }
 0x131   :  { %476 = vmatpush1.bf16.msra.mxu1 %v2082_v20  ;;  %v2420_v20 = vmov 0  }
 0x132   :  { %477 = vmatprep.subr.bf16.mxu1 %v2087_v21  ;;  %564 = vmatprep.mubr.bf16.mxu0 %v2420_v20  ;;  %v2593_v21 = vsub.s32 1, %v182_v52  ;;  %v2139_v52 = vld [vmem:[#allocation5 + $0x30] ss:$8 sps:$4 sm:$0xff]  }
 0x135   :  { %478 = vmatpush1.bf16.msra.mxu1 %v2085_v22  ;;  %v303_v22 = vld [vmem:[%s2792_s10 + $0x1] sm:$0x3] }
 0x136   :  { %479 = vmatprep.subr.bf16.mxu1 %v2090_v23 }
 0x139   :  { %480 = vmatpush1.bf16.msra.mxu1 %v2088_v24  ;;  %v312_v24 = vrot.slane %v303_v22, %v2593_v21 }
 0x13a   :  { %481 = vmatprep.subr.bf16.mxu1 %v2093_v25  ;;  %v308_v25 = vrot.slane %v303_v22, %v2588_v54  ;;  %v2189_v22 = vld [vmem:[#allocation7 + $0x34] ss:$8 sps:$4 sm:$0xff]  }
 0x13d   :  { %482 = vmatpush1.bf16.msra.mxu1 %v2091_v26 }
 0x13e   :  { %483 = vmatprep.subr.bf16.mxu1 %v2096_v27 }
 0x141   :  { %484 = vmatpush1.bf16.msra.mxu1 %v2094_v28 }
 0x142   :  { %485 = vmatprep.subr.bf16.mxu1 %v2099_v29 }
 0x145   :  { %486 = vmatpush1.bf16.msra.mxu1 %v2097_v30 }
 0x146   :  { %487 = vmatprep.subr.bf16.mxu1 %v2102_v31 }
 0x149   :  { %488 = vmatpush1.bf16.msra.mxu1 %v2100_v32 }
 0x14a   :  { %489 = vmatprep.subr.bf16.mxu1 %v2105_v33 }
 0x14d   :  { %490 = vmatpush1.bf16.msra.mxu1 %v2103_v34 }
 0x14e   :  { %491 = vmatprep.subr.bf16.mxu1 %v2108_v35 }
 0x151   :  { %492 = vmatpush1.bf16.msra.mxu1 %v2106_v36 }
 0x152   :  { %493 = vmatprep.subr.bf16.mxu1 %v2111_v37 }
 0x155   :  { %494 = vmatpush1.bf16.msra.mxu1 %v2109_v38 }
 0x156   :  { %495 = vmatprep.subr.bf16.mxu1 %v2114_v39 }
 0x159   :  { %496 = vmatpush1.bf16.msra.mxu1 %v2112_v40 }
 0x15a   :  { %497 = vmatprep.subr.bf16.mxu1 %v2117_v41 }
 0x15d   :  { %498 = vmatpush1.bf16.msra.mxu1 %v2115_v42 }
 0x15e   :  { %499 = vmatprep.subr.bf16.mxu1 %v2120_v43 }
 0x161   :  { %500 = vmatpush1.bf16.msra.mxu1 %v2118_v44  ;;  %v2132_v44 = vld [vmem:[#allocation5 + $0x4] ss:$8 sps:$4 sm:$0xff]  }
 0x162   :  { %501 = vmatprep.subr.bf16.mxu1 %v2123_v45 }
 0x165   :  { %502 = vmatpush1.bf16.msra.mxu1 %v2121_v46  ;;  %v2130_v46 = vld [vmem:[#allocation5] ss:$8 sps:$4 sm:$0xff]  }
 0x166   :  { %503 = vmatprep.subr.bf16.mxu1 %v2126_v47  ;;  %v2135_v47 = vld [vmem:[#allocation5 + $0x14] ss:$8 sps:$4 sm:$0xff]  }
 0x169   :  { %504 = vmatpush1.bf16.msra.mxu1 %v2124_v48  ;;  %v2133_v48 = vld [vmem:[#allocation5 + $0x10] ss:$8 sps:$4 sm:$0xff]  }
 0x16a   :  { %505 = vmatprep.subr.bf16.mxu1 %v2129_v49  ;;  %v2138_v49 = vld [vmem:[#allocation5 + $0x24] ss:$8 sps:$4 sm:$0xff]  }
 0x16d   :  { %506 = vmatpush1.bf16.msra.mxu1 %v2127_v50  ;;  %v2136_v50 = vld [vmem:[#allocation5 + $0x20] ss:$8 sps:$4 sm:$0xff]  }
 0x203   :  { %v2053_v58 = vpop.f32.mrb[0].mxu1 }
 0x204   :  { %v242_v59 = vadd.f32 %v2053_v58, %v184_v56  ;;  %v233_v60 = vpop.f32.mrb[1].mxu1  ;;  %v2148_v58 = vld [vmem:[#allocation5 + $0x60] ss:$8 sps:$4 sm:$0xff]  }
 0x205   :  { %v234_v61 = vadd.f32 %v233_v60, %v184_v56  ;;  %v2054_v62 = vpop.f32.mrb[2].mxu1  ;;  %v2151_v60 = vld [vmem:[#allocation5 + $0x70] ss:$8 sps:$4 sm:$0xff]  }
 0x206   :  { %v261_v63 = vsub.f32 %v257_v57, %v242_v59  ;;  %v245_v0 = vadd.f32 %v2054_v62, %v184_v56  ;;  %v236_v1 = vpop.f32.mrb[3].mxu1  ;;  %v250_v4 = vmax.f32 %v242_v59, 0.0  ;;  %v2153_v59 = vld [vmem:[#allocation5 + $0x74] ss:$8 sps:$4 sm:$0xff]  }
 0x207   :  { %v259_v2 = vsub.f32 %v257_v57, %v234_v61  ;;  %v237_v3 = vadd.f32 %v236_v1, %v184_v56  ;;  %v248_v9 = vmax.f32 %v234_v61, 0.0  ;;  %v2145_v56 = vld [vmem:[#allocation5 + $0x50] ss:$8 sps:$4 sm:$0xff]   ;;  %v2154_v61 = vld [vmem:[#allocation5 + $0x80] ss:$8 sps:$4 sm:$0xff]  }
 0x208   :  { %v251_v5 = vmax.f32 %v245_v0, 0.0  ;;  %v262_v8 = vsub.f32 %v257_v57, %v245_v0  ;;  %v265_v12 = vmax.f32 %v261_v63, 0.0  ;;  %v2159_v62 = vld [vmem:[#allocation5 + $0x94] ss:$8 sps:$4 sm:$0xff]   ;;  %v2157_v63 = vld [vmem:[#allocation5 + $0x90] ss:$8 sps:$4 sm:$0xff]  }
 0x209   :  { %v249_v10 = vmax.f32 %v237_v3, 0.0  ;;  %v260_v11 = vsub.f32 %v257_v57, %v237_v3  ;;  %v263_v15 = vmax.f32 %v259_v2, 0.0  ;;  %v2150_v57 = vld [vmem:[#allocation5 + $0x64] ss:$8 sps:$4 sm:$0xff]   ;;  %v2160_v1 = vld [vmem:[#allocation5 + $0xa0] ss:$8 sps:$4 sm:$0xff]  }
 0x20a   :  { %v266_v13 = vmax.f32 %v262_v8, 0.0  ;;  %v269_v14 = vpack.c.bf16 %v251_v5, %v250_v4  ;;  %v2162_v0 = vld [vmem:[#allocation5 + $0xa4] ss:$8 sps:$4 sm:$0xff]   ;;  %v2165_v2 = vld [vmem:[#allocation5 + $0xb4] ss:$8 sps:$4 sm:$0xff]  }
 0x20b   :  { %v264_v16 = vmax.f32 %v260_v11, 0.0  ;;  %v267_v17 = vpack.c.bf16 %v249_v10, %v248_v9  ;;  %v2163_v3 = vld [vmem:[#allocation5 + $0xb0] ss:$8 sps:$4 sm:$0xff]   ;;  %v2168_v4 = vld [vmem:[#allocation5 + $0xc4] ss:$8 sps:$4 sm:$0xff]  }
 0x20c   :  { %v270_v18 = vpack.c.bf16 %v266_v13, %v265_v12  ;;  %v2166_v5 = vld [vmem:[#allocation5 + $0xc0] ss:$8 sps:$4 sm:$0xff]   ;;  %v2171_v8 = vld [vmem:[#allocation5 + $0xd4] ss:$8 sps:$4 sm:$0xff]   ;;  %v2169_v9 = vld [vmem:[#allocation5 + $0xd0] ss:$8 sps:$4 sm:$0xff]  }
 0x20d   :  { %v268_v19 = vpack.c.bf16 %v264_v16, %v263_v15  ;;  %v2174_v10 = vld [vmem:[#allocation5 + $0xe4] ss:$8 sps:$4 sm:$0xff]   ;;  %v2172_v11 = vld [vmem:[#allocation5 + $0xe0] ss:$8 sps:$4 sm:$0xff]   ;;  %v2177_v12 = vld [vmem:[#allocation5 + $0xf4] ss:$8 sps:$4 sm:$0xff]  }
 0x20e   :  { %v2175_v13 = vld [vmem:[#allocation5 + $0xf0] ss:$8 sps:$4 sm:$0xff]   ;;  %v2180_v15 = vld [vmem:[#allocation7 + $0x4] ss:$8 sps:$4 sm:$0xff]   ;;  %v2183_v16 = vld [vmem:[#allocation7 + $0x14] ss:$8 sps:$4 sm:$0xff]  }
 0x20f   :  { %507 = vmatprep.mubr.bf16.mxu1 %v268_v19  ;;  %1070 = vmatprep.subr.bf16.mxu1 %v2180_v15  ;;  %v2184_v19 = vld [vmem:[#allocation7 + $0x20] ss:$8 sps:$4 sm:$0xff]  }
 0x210   :  { %508 = vmatmul.mubr.bf16.vlgmr.msra.gmra.mrb[4].mxu1 %v267_v17  ;;  %v2181_v17 = vld [vmem:[#allocation7 + $0x10] ss:$8 sps:$4 sm:$0xff]  }
 0x211   :  { %517 = vmatprep.mubr.bf16.mxu1 %v270_v18  ;;  %v2186_v18 = vld [vmem:[#allocation7 + $0x24] ss:$8 sps:$4 sm:$0xff]  }
 0x218   :  { %518 = vmatmul.mubr.bf16.gmra.mrb[8].mxu1 %v269_v14  ;;  %v2178_v14 = vld [vmem:[#allocation7] ss:$8 sps:$4 sm:$0xff]  }
 0x219   :  { %1071 = vmatpush1.bf16.msra.mxu1 %v2178_v14 }
 0x21a   :  { %1072 = vmatprep.subr.bf16.mxu1 %v2183_v16 }
 0x21d   :  { %1073 = vmatpush1.bf16.msra.mxu1 %v2181_v17 }
 0x21e   :  { %1074 = vmatprep.subr.bf16.mxu1 %v2186_v18 }
 0x221   :  { %1075 = vmatpush1.bf16.msra.mxu1 %v2184_v19 }
 0x222   :  { %1076 = vmatprep.subr.bf16.mxu1 %v2189_v22 }
 0x2e3   :  { %v509_v23 = vpop.f32.mrb[4].mxu1 }
 0x2e4   :  { %v511_v26 = vpop.f32.mrb[5].mxu1  ;;  %v2606_v32 = vadd.f32 %v509_v23, %v308_v25  ;;  %v2187_v23 = vld [vmem:[#allocation7 + $0x30] ss:$8 sps:$4 sm:$0xff]  }
 0x2e5   :  { %v513_v27 = vpop.f32.mrb[6].mxu1  ;;  %v2602_v30 = vadd.f32 %v511_v26, %v312_v24  ;;  %1077 = vmatpush1.bf16.msra.mxu1 %v2187_v23  ;;  %v2195_v26 = vld [vmem:[#allocation7 + $0x54] ss:$8 sps:$4 sm:$0xff]  }
 0x2e6   :  { %v2600_v28 = vadd.f32 %v513_v27, %v308_v25  ;;  %v515_v29 = vpop.f32.mrb[7].mxu1  ;;  %v2193_v27 = vld [vmem:[#allocation7 + $0x50] ss:$8 sps:$4 sm:$0xff]  }
 0x2e7   :  { %v2604_v31 = vadd.f32 %v515_v29, %v312_v24  ;;  %v2198_v29 = vld [vmem:[#allocation7 + $0x64] ss:$8 sps:$4 sm:$0xff]  }
 0x2e8   :  { %v528_v34 = vpack.c.bf16 %v2600_v28, %v2606_v32 }
 0x2e9   :  { %v529_v33 = vpack.c.bf16 %v2604_v31, %v2602_v30 }
 0x2eb   :  { %v519_v35 = vpop.f32.mrb[8].mxu1  ;;  %532 = vmatprep.subr.bf16.mxu0 %v529_v33  ;;  %v2196_v33 = vld [vmem:[#allocation7 + $0x60] ss:$8 sps:$4 sm:$0xff]  }
 0x2ec   :  { %v521_v36 = vpop.f32.mrb[9].mxu1  ;;  %533 = vmatpush1.bf16.msra.mxu0 %v528_v34  ;;  %v2618_v42 = vadd.f32 %v519_v35, %v308_v25  ;;  %v2201_v34 = vld [vmem:[#allocation7 + $0x74] ss:$8 sps:$4 sm:$0xff]   ;;  %v2199_v35 = vld [vmem:[#allocation7 + $0x70] ss:$8 sps:$4 sm:$0xff]  }
 0x2ed   :  { %v523_v37 = vpop.f32.mrb[10].mxu1  ;;  %v2614_v40 = vadd.f32 %v521_v36, %v312_v24  ;;  %v2204_v36 = vld [vmem:[#allocation7 + $0x84] ss:$8 sps:$4 sm:$0xff]  }
 0x2ee   :  { %v2612_v38 = vadd.f32 %v523_v37, %v308_v25  ;;  %v525_v39 = vpop.f32.mrb[11].mxu1  ;;  %v2190_v25 = vld [vmem:[#allocation7 + $0x40] ss:$8 sps:$4 sm:$0xff]  }
 0x2ef   :  { %v2616_v41 = vadd.f32 %v525_v39, %v312_v24  ;;  %v2192_v24 = vld [vmem:[#allocation7 + $0x44] ss:$8 sps:$4 sm:$0xff]   ;;  %v2202_v37 = vld [vmem:[#allocation7 + $0x80] ss:$8 sps:$4 sm:$0xff]   ;;  %v2207_v39 = vld [vmem:[#allocation7 + $0x94] ss:$8 sps:$4 sm:$0xff]  }
 0x2f0   :  { %v530_v45 = vpack.c.bf16 %v2612_v38, %v2618_v42  ;;  %1078 = vmatprep.subr.bf16.mxu1 %v2192_v24 }
 0x2f1   :  { %v531_v43 = vpack.c.bf16 %v2616_v41, %v2614_v40  ;;  %1079 = vmatpush1.bf16.msra.mxu1 %v2190_v25 }
 0x2f2   :  { %1080 = vmatprep.subr.bf16.mxu1 %v2195_v26 }
 0x2f3   :  { %534 = vmatprep.subr.bf16.mxu0 %v531_v43  ;;  %v2205_v43 = vld [vmem:[#allocation7 + $0x90] ss:$8 sps:$4 sm:$0xff]  }
 0x2f4   :  { %535 = vmatpush1.bf16.msra.mxu0 %v530_v45  ;;  %v2208_v45 = vld [vmem:[#allocation7 + $0xa0] ss:$8 sps:$4 sm:$0xff]  }
 0x2f5   :  { %801 = vmatprep.subr.bf16.mxu0 %v2132_v44  ;;  %1081 = vmatpush1.bf16.msra.mxu1 %v2193_v27  ;;  %v2210_v44 = vld [vmem:[#allocation7 + $0xa4] ss:$8 sps:$4 sm:$0xff]  }
 0x2f6   :  { %1082 = vmatprep.subr.bf16.mxu1 %v2198_v29 }
 0x2f7   :  { %1871 = vmatmul.mubr.msk.bf16.vlgmr.msra.gmra.mrb[4].mxu0 %vm115_vm0, %v2571_v6  ;;  %v2147_v6 = vld [vmem:[#allocation5 + $0x54] ss:$8 sps:$4 sm:$0xff]  }
 0x2f8   :  { %574 = vmatprep.mubr.bf16.mxu0 %v2420_v20  ;;  %802 = vmatpush1.bf16.msra.mxu0 %v2130_v46  ;;  %v2213_v46 = vld [vmem:[#allocation7 + $0xb4] ss:$8 sps:$4 sm:$0xff]  }
 0x2f9   :  { %803 = vmatprep.subr.bf16.mxu0 %v2135_v47  ;;  %1083 = vmatpush1.bf16.msra.mxu1 %v2196_v33  ;;  %v2211_v47 = vld [vmem:[#allocation7 + $0xb0] ss:$8 sps:$4 sm:$0xff]  }
 0x2fa   :  { %1084 = vmatprep.subr.bf16.mxu1 %v2201_v34 }
 0x2fc   :  { %804 = vmatpush1.bf16.msra.mxu0 %v2133_v48  ;;  %v2216_v48 = vld [vmem:[#allocation7 + $0xc4] ss:$8 sps:$4 sm:$0xff]  }
 0x2fd   :  { %805 = vmatprep.subr.bf16.mxu0 %v2138_v49  ;;  %1085 = vmatpush1.bf16.msra.mxu1 %v2199_v35  ;;  %v2214_v49 = vld [vmem:[#allocation7 + $0xc0] ss:$8 sps:$4 sm:$0xff]  }
 0x2fe   :  { %1086 = vmatprep.subr.bf16.mxu1 %v2204_v36 }
 0x2ff   :  { %1872 = vmatmul.mubr.msk.bf16.gmra.mrb[8].mxu0 %vm115_vm0, %v2578_v7  ;;  %v2156_v7 = vld [vmem:[#allocation5 + $0x84] ss:$8 sps:$4 sm:$0xff]  }
 0x300   :  { %806 = vmatpush1.bf16.msra.mxu0 %v2136_v50  ;;  %v2219_v50 = vld [vmem:[#allocation7 + $0xd4] ss:$8 sps:$4 sm:$0xff]  }
 0x301   :  { %807 = vmatprep.subr.bf16.mxu0 %v2141_v51  ;;  %1087 = vmatpush1.bf16.msra.mxu1 %v2202_v37  ;;  %v2217_v51 = vld [vmem:[#allocation7 + $0xd0] ss:$8 sps:$4 sm:$0xff]  }
 0x302   :  { %1088 = vmatprep.subr.bf16.mxu1 %v2207_v39 }
 0x304   :  { %808 = vmatpush1.bf16.msra.mxu0 %v2139_v52 }
 0x305   :  { %809 = vmatprep.subr.bf16.mxu0 %v2144_v53  ;;  %1089 = vmatpush1.bf16.msra.mxu1 %v2205_v43 }
 0x306   :  { %1090 = vmatprep.subr.bf16.mxu1 %v2210_v44 }
 0x308   :  { %810 = vmatpush1.bf16.msra.mxu0 %v2142_v55 }
 0x309   :  { %811 = vmatprep.subr.bf16.mxu0 %v2147_v6  ;;  %1091 = vmatpush1.bf16.msra.mxu1 %v2208_v45 }
 0x30a   :  { %1092 = vmatprep.subr.bf16.mxu1 %v2213_v46  ;;  %v898_v46 = vld [vmem:[%s2792_s10 + $0x5] sm:$0x3] }
 0x30c   :  { %812 = vmatpush1.bf16.msra.mxu0 %v2145_v56 }
 0x30d   :  { %813 = vmatprep.subr.bf16.mxu0 %v2150_v57  ;;  %1093 = vmatpush1.bf16.msra.mxu1 %v2211_v47 }
 0x30e   :  { %1094 = vmatprep.subr.bf16.mxu1 %v2216_v48  ;;  %v907_v48 = vrot.slane %v898_v46, %v2593_v21 }
 0x310   :  { %814 = vmatpush1.bf16.msra.mxu0 %v2148_v58 }
 0x311   :  { %815 = vmatprep.subr.bf16.mxu0 %v2153_v59  ;;  %1095 = vmatpush1.bf16.msra.mxu1 %v2214_v49  ;;  %v903_v49 = vrot.slane %v898_v46, %v2588_v54  ;;  %v2279_v46 = vld [vmem:[%s2789_s7 + $0x10] sm:$0xff]  }
 0x312   :  { %1096 = vmatprep.subr.bf16.mxu1 %v2219_v50 }
 0x314   :  { %816 = vmatpush1.bf16.msra.mxu0 %v2151_v60 }
 0x315   :  { %817 = vmatprep.subr.bf16.mxu0 %v2156_v7  ;;  %1097 = vmatpush1.bf16.msra.mxu1 %v2217_v51 }
 0x318   :  { %818 = vmatpush1.bf16.msra.mxu0 %v2154_v61 }
 0x319   :  { %819 = vmatprep.subr.bf16.mxu0 %v2159_v62 }
 0x31c   :  { %820 = vmatpush1.bf16.msra.mxu0 %v2157_v63 }
 0x31d   :  { %821 = vmatprep.subr.bf16.mxu0 %v2162_v0 }
 0x320   :  { %822 = vmatpush1.bf16.msra.mxu0 %v2160_v1 }
 0x321   :  { %823 = vmatprep.subr.bf16.mxu0 %v2165_v2 }
 0x324   :  { %824 = vmatpush1.bf16.msra.mxu0 %v2163_v3 }
 0x325   :  { %825 = vmatprep.subr.bf16.mxu0 %v2168_v4  ;;  %v2220_v4 = vld [vmem:[#allocation7 + $0xe0] ss:$8 sps:$4 sm:$0xff]  }
 0x328   :  { %826 = vmatpush1.bf16.msra.mxu0 %v2166_v5  ;;  %v2225_v5 = vld [vmem:[#allocation7 + $0xf4] ss:$8 sps:$4 sm:$0xff]  }
 0x329   :  { %827 = vmatprep.subr.bf16.mxu0 %v2171_v8  ;;  %v2223_v8 = vld [vmem:[#allocation7 + $0xf0] ss:$8 sps:$4 sm:$0xff]  }
 0x32c   :  { %828 = vmatpush1.bf16.msra.mxu0 %v2169_v9 }
 0x32d   :  { %829 = vmatprep.subr.bf16.mxu0 %v2174_v10 }
 0x330   :  { %830 = vmatpush1.bf16.msra.mxu0 %v2172_v11 }
 0x331   :  { %831 = vmatprep.subr.bf16.mxu0 %v2177_v12 }
 0x334   :  { %832 = vmatpush1.bf16.msra.mxu0 %v2175_v13 }
 0x3ca   :  { %v566_v52 = vpop.f32.mrb[4].mxu0 }
 0x3cb   :  { %v568_v53 = vpop.f32.mrb[5].mxu0  ;;  %v585_v6 = vadd.f32 %v566_v52, %v2606_v32 }
 0x3cc   :  { %v570_v55 = vpop.f32.mrb[6].mxu0  ;;  %v586_v58 = vadd.f32 %v568_v53, %v2602_v30 }
 0x3cd   :  { %v587_v56 = vadd.f32 %v570_v55, %v2600_v28  ;;  %v572_v57 = vpop.f32.mrb[7].mxu0 }
 0x3ce   :  { %v588_v59 = vadd.f32 %v572_v57, %v2604_v31  ;;  %v2222_v31 = vld [vmem:[#allocation7 + $0xe4] ss:$8 sps:$4 sm:$0xff]  }
 0x3cf   :  { %v593_v60 = vpack.c.bf16 %v587_v56, %v585_v6  ;;  %1098 = vmatprep.subr.bf16.mxu1 %v2222_v31  ;;  %v2294_v31 = vld [vmem:[%s2783_s1] sm:$0xff]  }
 0x3d0   :  { %v594_v7 = vpack.c.bf16 %v588_v59, %v586_v58  ;;  %1099 = vmatpush1.bf16.msra.mxu1 %v2220_v4  ;;  %v2229_v4 = vld [vmem:[#allocation8 + $0x10] ss:$8 sps:$4 sm:$0xff]  }
 0x3d1   :  { %1100 = vmatprep.subr.bf16.mxu1 %v2225_v5  ;;  %v2234_v5 = vld [vmem:[#allocation8 + $0x24] ss:$8 sps:$4 sm:$0xff]  }
 0x3d2   :  { %v576_v61 = vpop.f32.mrb[8].mxu0  ;;  %833 = vmatprep.mubr.bf16.mxu0 %v594_v7 }
 0x3d3   :  { %v578_v62 = vpop.f32.mrb[9].mxu0  ;;  %834 = vmatmul.mubr.bf16.vlgmr.msra.gmra.mrb[12].mxu0 %v593_v60  ;;  %v589_v0 = vadd.f32 %v576_v61, %v2618_v42 }
 0x3d4   :  { %v580_v63 = vpop.f32.mrb[10].mxu0  ;;  %v590_v32 = vadd.f32 %v578_v62, %v2614_v40  ;;  %1101 = vmatpush1.bf16.msra.mxu1 %v2223_v8  ;;  %v2232_v8 = vld [vmem:[#allocation8 + $0x20] ss:$8 sps:$4 sm:$0xff]  }
 0x3d5   :  { %v591_v1 = vadd.f32 %v580_v63, %v2612_v38  ;;  %v582_v2 = vpop.f32.mrb[11].mxu0  ;;  %v629_v38 = vld [vmem:[%s2792_s10 + $0x3] sm:$0x3] }
 0x3d6   :  { %v592_v28 = vadd.f32 %v582_v2, %v2616_v41  ;;  %v634_v40 = vrot.slane %v629_v38, %v2588_v54  ;;  %v638_v41 = vrot.slane %v629_v38, %v2593_v21  ;;  %v2237_v38 = vld [vmem:[#allocation8 + $0x34] ss:$8 sps:$4 sm:$0xff]  }
 0x3d7   :  { %v595_v3 = vpack.c.bf16 %v591_v1, %v589_v0 }
 0x3d8   :  { %v596_v30 = vpack.c.bf16 %v592_v28, %v590_v32  ;;  %v2228_v32 = vld [vmem:[#allocation8 + $0x4] ss:$8 sps:$4 sm:$0xff]  }
 0x3da   :  { %843 = vmatprep.mubr.bf16.mxu0 %v596_v30  ;;  %v2231_v30 = vld [vmem:[#allocation8 + $0x14] ss:$8 sps:$4 sm:$0xff]  }
 0x3db   :  { %844 = vmatmul.mubr.bf16.gmra.mrb[16].mxu0 %v595_v3  ;;  %v2226_v3 = vld [vmem:[#allocation8] ss:$8 sps:$4 sm:$0xff]  }
 0x3dc   :  { %1159 = vmatprep.mubr.bf16.mxu0 %v2420_v20 }
 0x4a6   :  { %v835_v42 = vpop.f32.mrb[12].mxu0 }
 0x4a7   :  { %v836_v9 = vadd.f32 %v835_v42, %v634_v40  ;;  %v837_v10 = vpop.f32.mrb[13].mxu0  ;;  %v2240_v42 = vld [vmem:[#allocation8 + $0x44] ss:$8 sps:$4 sm:$0xff]  }
 0x4a8   :  { %v838_v11 = vadd.f32 %v837_v10, %v638_v41  ;;  %v839_v12 = vpop.f32.mrb[14].mxu0  ;;  %v2241_v10 = vld [vmem:[#allocation8 + $0x50] ss:$8 sps:$4 sm:$0xff]  }
 0x4a9   :  { %v840_v13 = vadd.f32 %v839_v12, %v634_v40  ;;  %v841_v14 = vpop.f32.mrb[15].mxu0  ;;  %v854_v16 = vmax.f32 %v836_v9, 0.0  ;;  %v2243_v9 = vld [vmem:[#allocation8 + $0x54] ss:$8 sps:$4 sm:$0xff]   ;;  %v2244_v12 = vld [vmem:[#allocation8 + $0x60] ss:$8 sps:$4 sm:$0xff]  }
 0x4aa   :  { %v842_v15 = vadd.f32 %v841_v14, %v638_v41  ;;  %v855_v18 = vmax.f32 %v838_v11, 0.0  ;;  %v2246_v11 = vld [vmem:[#allocation8 + $0x64] ss:$8 sps:$4 sm:$0xff]   ;;  %v2247_v14 = vld [vmem:[#allocation8 + $0x70] ss:$8 sps:$4 sm:$0xff]  }
 0x4ab   :  { %v856_v17 = vmax.f32 %v840_v13, 0.0  ;;  %v2249_v13 = vld [vmem:[#allocation8 + $0x74] ss:$8 sps:$4 sm:$0xff]  }
 0x4ac   :  { %v857_v19 = vmax.f32 %v842_v15, 0.0  ;;  %v2252_v15 = vld [vmem:[#allocation8 + $0x84] ss:$8 sps:$4 sm:$0xff]  }
 0x4ad   :  { %v862_v22 = vpack.c.bf16 %v856_v17, %v854_v16  ;;  %v2250_v16 = vld [vmem:[#allocation8 + $0x80] ss:$8 sps:$4 sm:$0xff]   ;;  %v2255_v17 = vld [vmem:[#allocation8 + $0x94] ss:$8 sps:$4 sm:$0xff]  }
 0x4ae   :  { %v863_v23 = vpack.c.bf16 %v857_v19, %v855_v18  ;;  %v845_v24 = vpop.f32.mrb[16].mxu0  ;;  %v2253_v18 = vld [vmem:[#allocation8 + $0x90] ss:$8 sps:$4 sm:$0xff]   ;;  %v2258_v19 = vld [vmem:[#allocation8 + $0xa4] ss:$8 sps:$4 sm:$0xff]  }
 0x4af   :  { %v846_v25 = vadd.f32 %v845_v24, %v634_v40  ;;  %v847_v26 = vpop.f32.mrb[17].mxu0  ;;  %v2259_v24 = vld [vmem:[#allocation8 + $0xb0] ss:$8 sps:$4 sm:$0xff]  }
 0x4b0   :  { %v848_v27 = vadd.f32 %v847_v26, %v638_v41  ;;  %v849_v29 = vpop.f32.mrb[18].mxu0  ;;  %1102 = vmatprep.mubr.bf16.mxu1 %v863_v23  ;;  %v2261_v23 = vld [vmem:[#allocation8 + $0xb4] ss:$8 sps:$4 sm:$0xff]   ;;  %v2262_v26 = vld [vmem:[#allocation8 + $0xc0] ss:$8 sps:$4 sm:$0xff]  }
 0x4b1   :  { %v850_v33 = vadd.f32 %v849_v29, %v634_v40  ;;  %v851_v34 = vpop.f32.mrb[19].mxu0  ;;  %1103 = vmatmul.mubr.bf16.vlgmr.msra.gmra.mrb[12].mxu1 %v862_v22  ;;  %v858_v36 = vmax.f32 %v846_v25, 0.0  ;;  %v2295_v40 = vld [vmem:[%s2783_s1 + $0x8] sm:$0xff]   ;;  %v2265_v29 = vld [vmem:[#allocation8 + $0xd0] ss:$8 sps:$4 sm:$0xff]  }
 0x4b2   :  { %v852_v35 = vadd.f32 %v851_v34, %v638_v41  ;;  %v859_v39 = vmax.f32 %v848_v27, 0.0  ;;  %v2235_v41 = vld [vmem:[#allocation8 + $0x30] ss:$8 sps:$4 sm:$0xff]   ;;  %v2256_v22 = vld [vmem:[#allocation8 + $0xa0] ss:$8 sps:$4 sm:$0xff]  }
 0x4b3   :  { %v860_v37 = vmax.f32 %v850_v33, 0.0  ;;  %v2264_v25 = vld [vmem:[#allocation8 + $0xc4] ss:$8 sps:$4 sm:$0xff]   ;;  %v2267_v27 = vld [vmem:[#allocation8 + $0xd4] ss:$8 sps:$4 sm:$0xff]  }
 0x4b4   :  { %v861_v43 = vmax.f32 %v852_v35, 0.0  ;;  %v2270_v33 = vld [vmem:[#allocation8 + $0xe4] ss:$8 sps:$4 sm:$0xff]   ;;  %v2268_v34 = vld [vmem:[#allocation8 + $0xe0] ss:$8 sps:$4 sm:$0xff]  }
 0x4b5   :  { %v864_v44 = vpack.c.bf16 %v860_v37, %v858_v36  ;;  %v2273_v35 = vld [vmem:[#allocation8 + $0xf4] ss:$8 sps:$4 sm:$0xff]   ;;  %v2271_v36 = vld [vmem:[#allocation8 + $0xf0] ss:$8 sps:$4 sm:$0xff]   ;;  %v2274_v37 = vld [vmem:[%s2789_s7 + $0x40] sm:$0xff]  }
 0x4b6   :  { %v865_v45 = vpack.c.bf16 %v861_v43, %v859_v39  ;;  %v2275_v39 = vld [vmem:[%s2789_s7] sm:$0xff]   ;;  %v2276_v43 = vld [vmem:[%s2789_s7 + $0x48] sm:$0xff]   ;;  %2005 = vmatprep.subr.bf16.mxu1 %v2274_v37 }
 0x4b7   :  { %2006 = vmatpush3.bf16.msra.mxu1 %v2275_v39 }
 0x4b8   :  { %1112 = vmatprep.mubr.bf16.mxu1 %v865_v45  ;;  %2007 = vmatprep.subr.bf16.mxu1 %v2276_v43  ;;  %v2278_v45 = vld [vmem:[%s2789_s7 + $0x50] sm:$0xff]  }
 0x4b9   :  { %1113 = vmatmul.mubr.bf16.gmra.mrb[16].mxu1 %v864_v44  ;;  %v2277_v44 = vld [vmem:[%s2789_s7 + $0x8] sm:$0xff]  }
 0x4bb   :  { %2008 = vmatpush3.bf16.msra.mxu1 %v2277_v44  ;;  %v2290_v44 = vld [vmem:[%s2790_s8] sm:$0xff]  }
 0x4bc   :  { %2009 = vmatprep.subr.bf16.mxu1 %v2278_v45  ;;  %v2291_v45 = vld [vmem:[%s2790_s8 + $0x8] sm:$0xff]  }
 0x4bf   :  { %2010 = vmatpush3.bf16.msra.mxu1 %v2279_v46  ;;  %v2292_v46 = vld [vmem:[%s2791_s9] sm:$0xff]  }
 0x584   :  { %v1104_v47 = vpop.f32.mrb[12].mxu1 }
 0x585   :  { %v1106_v50 = vpop.f32.mrb[13].mxu1  ;;  %v2654_v56 = vadd.f32 %v1104_v47, %v903_v49  ;;  %v2280_v47 = vld [vmem:[%s2789_s7 + $0x58] sm:$0xff]  }
 0x586   :  { %v1108_v51 = vpop.f32.mrb[14].mxu1  ;;  %v2650_v55 = vadd.f32 %v1106_v50, %v907_v48  ;;  %2011 = vmatprep.subr.bf16.mxu1 %v2280_v47  ;;  %v2283_v50 = vld [vmem:[%s2789_s7 + $0x20] sm:$0xff]  }
 0x587   :  { %v2648_v52 = vadd.f32 %v1108_v51, %v903_v49  ;;  %v1110_v53 = vpop.f32.mrb[15].mxu1  ;;  %v2284_v51 = vld [vmem:[%s2789_s7 + $0x68] sm:$0xff]  }
 0x588   :  { %v2652_v6 = vadd.f32 %v1110_v53, %v907_v48 }
 0x589   :  { %v1123_v58 = vpack.c.bf16 %v2648_v52, %v2654_v56 }
 0x58a   :  { %v1124_v57 = vpack.c.bf16 %v2652_v6, %v2650_v55 }
 0x58c   :  { %v1114_v59 = vpop.f32.mrb[16].mxu1  ;;  %1127 = vmatprep.subr.bf16.mxu0 %v1124_v57 }
 0x58d   :  { %v1116_v60 = vpop.f32.mrb[17].mxu1  ;;  %1128 = vmatpush1.bf16.msra.mxu0 %v1123_v58  ;;  %v2666_v1 = vadd.f32 %v1114_v59, %v903_v49 }
 0x58e   :  { %v1118_v7 = vpop.f32.mrb[18].mxu1  ;;  %v2662_v63 = vadd.f32 %v1116_v60, %v907_v48 }
 0x58f   :  { %v2660_v61 = vadd.f32 %v1118_v7, %v903_v49  ;;  %v1120_v62 = vpop.f32.mrb[19].mxu1  ;;  %v2282_v49 = vld [vmem:[%s2789_s7 + $0x60] sm:$0xff]  }
 0x590   :  { %v2664_v0 = vadd.f32 %v1120_v62, %v907_v48  ;;  %v2281_v48 = vld [vmem:[%s2789_s7 + $0x18] sm:$0xff]  }
 0x591   :  { %v1125_v28 = vpack.c.bf16 %v2660_v61, %v2666_v1  ;;  %2012 = vmatpush3.bf16.msra.mxu1 %v2281_v48 }
 0x592   :  { %v1126_v2 = vpack.c.bf16 %v2664_v0, %v2662_v63  ;;  %2013 = vmatprep.subr.bf16.mxu1 %v2282_v49 }
 0x594   :  { %1129 = vmatprep.subr.bf16.mxu0 %v1126_v2 }
 0x595   :  { %1130 = vmatpush1.bf16.msra.mxu0 %v1125_v28  ;;  %2014 = vmatpush3.bf16.msra.mxu1 %v2283_v50 }
 0x596   :  { %1396 = vmatprep.subr.bf16.mxu0 %v2228_v32  ;;  %2015 = vmatprep.subr.bf16.mxu1 %v2284_v51  ;;  %v1971_v51 = vld [vmem:[%s2792_s10 + $0x9] ss:$0 sm:$0xff] }
 0x598   :  { %1937 = vmatmul.mubr.msk.bf16.vlgmr.msra.gmra.mrb[20].mxu0 %vm115_vm0, %v2294_v31 }
 0x599   :  { %1169 = vmatprep.mubr.bf16.mxu0 %v2420_v20  ;;  %1397 = vmatpush1.bf16.msra.mxu0 %v2226_v3  ;;  %v2238_v20 = vld [vmem:[#allocation8 + $0x40] ss:$8 sps:$4 sm:$0xff]  }
 0x59a   :  { %1398 = vmatprep.subr.bf16.mxu0 %v2231_v30 }
 0x59d   :  { %1399 = vmatpush1.bf16.msra.mxu0 %v2229_v4 }
 0x59e   :  { %1400 = vmatprep.subr.bf16.mxu0 %v2234_v5 }
 0x5a0   :  { %1938 = vmatmul.mubr.msk.bf16.gmra.mrb[24].mxu0 %vm115_vm0, %v2295_v40  ;;  %v1224_v40 = vld [vmem:[%s2792_s10 + $0x7] sm:$0x3] }
 0x5a1   :  { %1401 = vmatpush1.bf16.msra.mxu0 %v2232_v8 }
 0x5a2   :  { %1402 = vmatprep.subr.bf16.mxu0 %v2237_v38 }
 0x5a5   :  { %1403 = vmatpush1.bf16.msra.mxu0 %v2235_v41  ;;  %v1229_v41 = vrot.slane %v1224_v40, %v2588_v54 }
 0x5a6   :  { %1404 = vmatprep.subr.bf16.mxu0 %v2240_v42  ;;  %v1233_v42 = vrot.slane %v1224_v40, %v2593_v21 }
 0x5a9   :  { %1405 = vmatpush1.bf16.msra.mxu0 %v2238_v20 }
 0x5aa   :  { %1406 = vmatprep.subr.bf16.mxu0 %v2243_v9 }
 0x5ad   :  { %1407 = vmatpush1.bf16.msra.mxu0 %v2241_v10 }
 0x5ae   :  { %1408 = vmatprep.subr.bf16.mxu0 %v2246_v11 }
 0x5b1   :  { %1409 = vmatpush1.bf16.msra.mxu0 %v2244_v12 }
 0x5b2   :  { %1410 = vmatprep.subr.bf16.mxu0 %v2249_v13 }
 0x5b5   :  { %1411 = vmatpush1.bf16.msra.mxu0 %v2247_v14 }
 0x5b6   :  { %1412 = vmatprep.subr.bf16.mxu0 %v2252_v15 }
 0x5b9   :  { %1413 = vmatpush1.bf16.msra.mxu0 %v2250_v16 }
 0x5ba   :  { %1414 = vmatprep.subr.bf16.mxu0 %v2255_v17 }
 0x5bd   :  { %1415 = vmatpush1.bf16.msra.mxu0 %v2253_v18 }
 0x5be   :  { %1416 = vmatprep.subr.bf16.mxu0 %v2258_v19 }
 0x5c1   :  { %1417 = vmatpush1.bf16.msra.mxu0 %v2256_v22 }
 0x5c2   :  { %1418 = vmatprep.subr.bf16.mxu0 %v2261_v23 }
 0x5c5   :  { %1419 = vmatpush1.bf16.msra.mxu0 %v2259_v24 }
 0x5c6   :  { %1420 = vmatprep.subr.bf16.mxu0 %v2264_v25 }
 0x5c9   :  { %1421 = vmatpush1.bf16.msra.mxu0 %v2262_v26 }
 0x5ca   :  { %1422 = vmatprep.subr.bf16.mxu0 %v2267_v27 }
 0x5cd   :  { %1423 = vmatpush1.bf16.msra.mxu0 %v2265_v29 }
 0x5ce   :  { %1424 = vmatprep.subr.bf16.mxu0 %v2270_v33 }
 0x5d1   :  { %1425 = vmatpush1.bf16.msra.mxu0 %v2268_v34 }
 0x5d2   :  { %1426 = vmatprep.subr.bf16.mxu0 %v2273_v35 }
 0x5d5   :  { %1427 = vmatpush1.bf16.msra.mxu0 %v2271_v36 }
 0x5d6   :  { %2055 = vmatprep.subr.bf16.mxu0 %v2290_v44 }
 0x66b   :  { %v1161_v53 = vpop.f32.mrb[20].mxu0 }
 0x66c   :  { %v1163_v57 = vpop.f32.mrb[21].mxu0  ;;  %v1180_v59 = vadd.f32 %v1161_v53, %v2654_v56 }
 0x66d   :  { %v1165_v58 = vpop.f32.mrb[22].mxu0  ;;  %v1181_v62 = vadd.f32 %v1163_v57, %v2650_v55 }
 0x66e   :  { %v1182_v60 = vadd.f32 %v1165_v58, %v2648_v52  ;;  %v1167_v7 = vpop.f32.mrb[23].mxu0 }
 0x66f   :  { %v1183_v2 = vadd.f32 %v1167_v7, %v2652_v6  ;;  %v2285_v6 = vld [vmem:[%s2789_s7 + $0x28] sm:$0xff]  }
 0x670   :  { %v1188_v32 = vpack.c.bf16 %v1182_v60, %v1180_v59  ;;  %2016 = vmatpush3.bf16.msra.mxu1 %v2285_v6 }
 0x671   :  { %v1189_v28 = vpack.c.bf16 %v1183_v2, %v1181_v62 }
 0x673   :  { %v1171_v3 = vpop.f32.mrb[24].mxu0  ;;  %1428 = vmatprep.mubr.bf16.mxu0 %v1189_v28 }
 0x674   :  { %v1173_v30 = vpop.f32.mrb[25].mxu0  ;;  %1429 = vmatmul.mubr.bf16.vlgmr.msra.gmra.mrb[28].mxu0 %v1188_v32  ;;  %v1184_v4 = vadd.f32 %v1171_v3, %v2666_v1  ;;  %v2286_v1 = vld [vmem:[%s2789_s7 + $0x70] sm:$0xff]  }
 0x675   :  { %v1175_v31 = vpop.f32.mrb[26].mxu0  ;;  %v1185_v56 = vadd.f32 %v1173_v30, %v2662_v63  ;;  %2017 = vmatprep.subr.bf16.mxu1 %v2286_v1  ;;  %v2288_v63 = vld [vmem:[%s2789_s7 + $0x78] sm:$0xff]   ;;  %2056 = vmatpush3.bf16.msra.mxu0 %v2290_v44 }
 0x676   :  { %v1186_v5 = vadd.f32 %v1175_v31, %v2660_v61  ;;  %v1177_v8 = vpop.f32.mrb[27].mxu0  ;;  %v2287_v61 = vld [vmem:[%s2789_s7 + $0x30] sm:$0xff]   ;;  %2057 = vmatprep.subr.bf16.mxu0 %v2291_v45 }
 0x677   :  { %v1187_v52 = vadd.f32 %v1177_v8, %v2664_v0  ;;  %2018 = vmatpush3.bf16.msra.mxu1 %v2287_v61  ;;  %v2289_v0 = vld [vmem:[%s2789_s7 + $0x38] sm:$0xff]   ;;  %v1988_v8 = vld [vmem:[%s2792_s10 + $0xa] ss:$0 sm:$0xff] }
 0x678   :  { %v1190_v38 = vpack.c.bf16 %v1186_v5, %v1184_v4  ;;  %2019 = vmatprep.subr.bf16.mxu1 %v2288_v63  ;;  %v2293_v5 = vld [vmem:[%s2791_s9 + $0x8] sm:$0xff]  }
 0x679   :  { %v1191_v55 = vpack.c.bf16 %v1187_v52, %v1185_v56  ;;  %2058 = vmatpush3.bf16.msra.mxu0 %v2291_v45 }
 0x67b   :  { %1438 = vmatprep.mubr.bf16.mxu0 %v1191_v55  ;;  %2020 = vmatpush3.bf16.msra.mxu1 %v2289_v0 }
 0x67c   :  { %1439 = vmatmul.mubr.bf16.gmra.mrb[32].mxu0 %v1190_v38  ;;  %2063 = vmatprep.subr.bf16.mxu1 %v2292_v46 }
 0x747   :  { %v1430_v20 = vpop.f32.mrb[28].mxu0 }
 0x748   :  { %v1431_v9 = vadd.f32 %v1430_v20, %v1229_v41  ;;  %v1432_v10 = vpop.f32.mrb[29].mxu0 }
 0x749   :  { %v1433_v11 = vadd.f32 %v1432_v10, %v1233_v42  ;;  %v1434_v12 = vpop.f32.mrb[30].mxu0  ;;  %v1993_v10 = vld [vmem:[%s2792_s10 + $0xb] ss:$0 sm:$0xff] }
 0x74a   :  { %v1435_v13 = vadd.f32 %v1434_v12, %v1229_v41  ;;  %v1436_v14 = vpop.f32.mrb[31].mxu0  ;;  %v1449_v16 = vmax.f32 %v1431_v9, 0.0 }
 0x74b   :  { %v1437_v15 = vadd.f32 %v1436_v14, %v1233_v42  ;;  %v1450_v18 = vmax.f32 %v1433_v11, 0.0 }
 0x74c   :  { %v1451_v17 = vmax.f32 %v1435_v13, 0.0 }
 0x74d   :  { %v1452_v19 = vmax.f32 %v1437_v15, 0.0 }
 0x74e   :  { %v1457_v22 = vpack.c.bf16 %v1451_v17, %v1449_v16 }
 0x74f   :  { %v1458_v23 = vpack.c.bf16 %v1452_v19, %v1450_v18  ;;  %v1440_v24 = vpop.f32.mrb[32].mxu0 }
 0x750   :  { %v1441_v25 = vadd.f32 %v1440_v24, %v1229_v41  ;;  %v1442_v26 = vpop.f32.mrb[33].mxu0 }
 0x751   :  { %v1443_v54 = vadd.f32 %v1442_v26, %v1233_v42  ;;  %v1444_v27 = vpop.f32.mrb[34].mxu0  ;;  %1628 = vmatprep.mubr.bf16.mxu1 %v1458_v23 }
 0x752   :  { %v1445_v21 = vadd.f32 %v1444_v27, %v1229_v41  ;;  %v1446_v29 = vpop.f32.mrb[35].mxu0  ;;  %1629 = vmatmul.mubr.bf16.vlgmr.msra.gmra.mrb[20].mxu1 %v1457_v22  ;;  %v1453_v34 = vmax.f32 %v1441_v25, 0.0 }
 0x753   :  { %v1447_v33 = vadd.f32 %v1446_v29, %v1233_v42  ;;  %v1454_v36 = vmax.f32 %v1443_v54, 0.0  ;;  %2064 = vmatpush3.bf16.msra.mxu1 %v2292_v46 }
 0x754   :  { %v1455_v35 = vmax.f32 %v1445_v21, 0.0  ;;  %2065 = vmatprep.subr.bf16.mxu1 %v2293_v5 }
 0x755   :  { %v1456_v37 = vmax.f32 %v1447_v33, 0.0 }
 0x756   :  { %v1459_v39 = vpack.c.bf16 %v1455_v35, %v1453_v34 }
 0x757   :  { %v1460_v43 = vpack.c.bf16 %v1456_v37, %v1454_v36  ;;  %2066 = vmatpush3.bf16.msra.mxu1 %v2293_v5 }
 0x759   :  { %1636 = vmatprep.mubr.bf16.mxu1 %v1460_v43 }
 0x75a   :  { %1637 = vmatmul.mubr.bf16.gmra.mrb[24].mxu1 %v1459_v39 }
 0x825   :  { %v2021_v47 = vpop.f32.mrb[20].mxu1 }
 0x826   :  { %v2022_v48 = vpop.f32.mrb[21].mxu1 }
 0x827   :  { %v2023_v49 = vadd.f32 %v2022_v48, %v2021_v47  ;;  %v2024_v50 = vpop.f32.mrb[22].mxu1 }
 0x828   :  { %v2025_v53 = vpop.f32.mrb[23].mxu1 }
 0x829   :  { %v2026_v57 = vadd.f32 %v2025_v53, %v2024_v50  ;;  %v1631_v58 = vadd.f32 %v2023_v49, %v1971_v51 }
 0x82b   :  { %v1634_v59 = vadd.f32 %v2026_v57, %v1971_v51 }
 0x82d   :  { %v1645_v60 = vpack.c.bf16 %v1634_v59, %v1631_v58  ;;  %v2027_v7 = vpop.f32.mrb[24].mxu1 }
 0x82e   :  { %v2028_v62 = vpop.f32.mrb[25].mxu1 }
 0x82f   :  { %v2029_v2 = vadd.f32 %v2028_v62, %v2027_v7  ;;  %v2030_v32 = vpop.f32.mrb[26].mxu1  ;;  %2059 = vmatprep.mubr.msk.bf16.mxu0 %vm115_vm0, %v1645_v60 }
 0x830   :  { %v2031_v28 = vpop.f32.mrb[27].mxu1 }
 0x831   :  { %v2032_v3 = vadd.f32 %v2031_v28, %v2030_v32  ;;  %v1639_v30 = vadd.f32 %v2029_v2, %v1971_v51 }
 0x833   :  { %v1642_v31 = vadd.f32 %v2032_v3, %v1971_v51 }
 0x835   :  { %v1646_v4 = vpack.c.bf16 %v1642_v31, %v1639_v30 }
 0x837   :  { %2060 = vmatmul.mubr.msk.bf16.vlgmr.msra.gmra.mrb[36].mxu0 %vm115_vm0, %v1646_v4 }
 0x90a   :  { %v2061_v56 = vpop.f32.mrb[36].mxu0 }
 0x90b   :  { %v1719_v52 = vadd.f32 %v2061_v56, %v1988_v8  ;;  %v1710_v38 = vpop.f32.mrb[37].mxu0 }
 0x90c   :  { %v1711_v55 = vadd.f32 %v1988_v8, %v1710_v38  ;;  %v2062_v6 = vpop.f32.mrb[38].mxu0 }
 0x90d   :  { %v1722_v1 = vadd.f32 %v2062_v6, %v1988_v8  ;;  %v1713_v61 = vpop.f32.mrb[39].mxu0  ;;  %v1727_v0 = vmax.f32 %v1719_v52, 0.0 }
 0x90e   :  { %v1714_v63 = vadd.f32 %v1988_v8, %v1713_v61  ;;  %v1725_v41 = vmax.f32 %v1711_v55, 0.0 }
 0x90f   :  { %v1728_v40 = vmax.f32 %v1722_v1, 0.0 }
 0x910   :  { %v1726_v42 = vmax.f32 %v1714_v63, 0.0 }
 0x911   :  { %v1730_v20 = vpack.c.bf16 %v1728_v40, %v1727_v0 }
 0x912   :  { %v1729_v9 = vpack.c.bf16 %v1726_v42, %v1725_v41 }
 0x914   :  { %2067 = vmatprep.mubr.msk.bf16.mxu1 %vm115_vm0, %v1729_v9 }
 0x915   :  { %2068 = vmatmul.mubr.msk.bf16.vlgmr.msra.gmra.mrb[28].mxu1 %vm115_vm0, %v1730_v20 }
 0x9e8   :  { %v2069_v11 = vpop.f32.mrb[28].mxu1 }
 0x9e9   :  { %v1803_v12 = vadd.f32 %v2069_v11, %v1993_v10  ;;  %v1794_v13 = vpop.f32.mrb[29].mxu1 }
 0x9ea   :  { %v1795_v14 = vadd.f32 %v1993_v10, %v1794_v13  ;;  %v2070_v15 = vpop.f32.mrb[30].mxu1 }
 0x9eb   :  { %1811 = vst [vmem:[#allocation10 + $0x10] sm:$0xff] %v1803_v12  ;;  %v1806_v16 = vadd.f32 %v2070_v15, %v1993_v10  ;;  %v1797_v17 = vpop.f32.mrb[31].mxu1 }
 0x9ec   :  { %1809 = vst [vmem:[#allocation10] sm:$0xff] %v1795_v14  ;;  %v1798_v18 = vadd.f32 %v1993_v10, %v1797_v17 }
 0x9ed   :  { %1812 = vst [vmem:[#allocation10 + $0x18] sm:$0xff] %v1806_v16 }
 0x9ee   :  { %1810 = vst [vmem:[#allocation10 + $0x8] sm:$0xff] %v1798_v18 }
 0x9ef   :  { %2395 = shalt.err (!%p2392_p8)
}
 0x9f0   :  { %s2396_s15 = scalar_lea.hbm %s2793_s11, 512 }
 0x9f1   :  { %p2397_p9 = scmp.ne.s32.totalorder %s2793_s11, %s2396_s15  ;;  %p2400_p10 = scmp.lt.u32.totalorder %s2396_s15, %s2793_s11 }
 0x9f3   :  { %p2402_p11 = pnand %p2400_p10, %p2397_p9 }
 0x9f5   :  { %2405 = shalt.err (!%p2402_p11)
}
 0x9f6   :  { %1824 = dma.vmem_to_hbm [thread:$0]  %s1819_s13, 512, %s2793_s11, [#allocation4], %s2416_s29, %s2416_s29, %s2417_s30  }
 0x9f7   :  { %2412 = dma.done.wait [#allocation4], 512  }
 0x9f8   :  { %2413 = vsyncadd [#allocation4], 4294966784 }
 0x9f9   :  { %1828 = vsyncpa [#allocation3], 1 }
 0x9fa   :  { %1829 = vsyncpa [#allocation6], 1 }
 0x9fb   :  { %1830 = vsyncpa [#allocation9], 1 }
 0x9fc   :  { %1831 = vsyncpa [#allocation4], 1 }

</bundles_post_ra>
